<compile_context>
chip_gen: v5e
topology: v5e:2x2
jax: 0.10.0
libtpu: 0.0.40
codegen_flags: <defaults>
</compile_context>

<pallas_src>
import functools
import math

import jax
import jax.numpy as jnp
from jax.experimental import pallas as pl
from jax.experimental.pallas import tpu as pltpu

N_COMMON = 64


def _round_up(n, m):
    return (n + m - 1) // m * m


def _device_kind():
    try:
        return jax.devices()[0].device_kind.lower()
    except Exception:
        return ""


def mlp_kernel(x_ref, w1t_ref, b1_ref, w2_ref, b2_ref, o_ref, *, tanh_dtype):
    # Cast the streamed x tile to bf16 in-kernel (VPU work, hidden under DMA).
    x = x_ref[...].astype(jnp.bfloat16)                        # (TILE_B, F)
    # Layer 1, transposed: hT = W1 @ x^T -> lane-dense (64, TILE_B), f32 acc.
    h_t = jax.lax.dot_general(
        w1t_ref[...], x,
        dimension_numbers=(((1,), (1,)), ((), ())),
        preferred_element_type=jnp.float32,
    )                                                          # (64, TILE_B)
    # Column bias + tanh on the lane-dense tile. bf16 on v6e/v7x, f32 on v4/v5.
    h_t = jnp.tanh((h_t + b1_ref[...]).astype(tanh_dtype))     # (64, TILE_B)
    # Layer 2: canonical (1, 64) @ (64, TILE_B) -> lane-dense (1, TILE_B).
    y = jnp.dot(w2_ref[...], h_t, preferred_element_type=jnp.float32)
    y = jnp.tanh(y + b2_ref[0, 0])                             # b2 scalar (SMEM)
    o_ref[...] = y.astype(o_ref.dtype)                         # dense (1, TILE_B) store


def mlp_forward(x, w1, b1, w2, b2, *, tile_b=None, tanh_dtype=None):
    """tanh(tanh(x @ w1 + b1) @ w2 + b2); w1 is (in, 64), w2 is (64, 1)."""
    B, F = x.shape
    kind = _device_kind()
    old_gen = ("v5" in kind) or ("v4" in kind)                  # no bf16 VPU/EUP
    big_vmem = ("v4" in kind) or ("v5" in kind) or ("v6" in kind)  # 128 MiB VMEM

    if tanh_dtype is None:
        tanh_dtype = jnp.float32 if old_gen else jnp.bfloat16
    if tile_b is None:
        tile_b = 16384 if big_vmem else 8192                    # v7x: 64 MiB budget
    vmem_limit = (64 if big_vmem else 32) * 1024 * 1024

    if B <= 128:
        tile_b = B                                  # single exact block, no padding
    else:
        tile_b = _round_up(tile_b, 128)
        # Keep >= 2 grid steps so v7x's second TensorCore gets work.
        tile_b = max(128, min(tile_b, _round_up(-(-B // 2), 128)))
    num_tiles = pl.cdiv(B, tile_b)                  # ragged final block is fine

    # Tiny parameter reshapes/casts (the large x tensor is left untouched).
    w1t = jnp.asarray(w1, jnp.float32).T.astype(jnp.bfloat16)          # (64, F)
    b1c = jnp.asarray(b1, jnp.float32).reshape(N_COMMON, 1)            # (64, 1)
    w2r = jnp.asarray(w2, jnp.float32).reshape(1, N_COMMON).astype(tanh_dtype)
    b2s = jnp.asarray(b2, jnp.float32).reshape(1, 1)                   # SMEM scalar

    out = pl.pallas_call(
        functools.partial(mlp_kernel, tanh_dtype=tanh_dtype),
        out_shape=jax.ShapeDtypeStruct((1, B), x.dtype),
        grid=(num_tiles,),
        in_specs=[
            # x streams; on v5e consider pipeline_mode=pl.Buffered(3) if DMA is exposed.
            pl.BlockSpec((tile_b, F), lambda i: (i, 0)),
            pl.BlockSpec((N_COMMON, F), lambda i: (0, 0)),        # W1^T resident
            pl.BlockSpec((N_COMMON, 1), lambda i: (0, 0)),        # b1 column resident
            pl.BlockSpec((1, N_COMMON), lambda i: (0, 0)),        # w2 row resident
            pl.BlockSpec(memory_space=pltpu.MemorySpace.SMEM),    # b2 scalar
        ],
        out_specs=pl.BlockSpec((1, tile_b), lambda i: (0, i)),
        compiler_params=pltpu.CompilerParams(
            dimension_semantics=("parallel",),      # megacore split on v7x
            vmem_limit_bytes=vmem_limit,
        ),
    )(x, w1t, b1c, w2r, b2s)

    return out.reshape(B, 1)


def init_params(key, input_size):
    # torch.nn.Linear default init: U(-1/sqrt(fan_in), 1/sqrt(fan_in)).
    # Weights stored as (in, out) so the reference computes x @ W (== x @ W_torch.T).
    k1, k2, k3, k4 = jax.random.split(key, 4)
    bound1 = 1.0 / math.sqrt(input_size)
    w1 = jax.random.uniform(k1, (input_size, N_COMMON), jnp.float32, -bound1, bound1)
    b1 = jax.random.uniform(k2, (N_COMMON,), jnp.float32, -bound1, bound1)
    bound2 = 1.0 / math.sqrt(N_COMMON)
    w2 = jax.random.uniform(k3, (N_COMMON, 1), jnp.float32, -bound2, bound2)
    b2 = jax.random.uniform(k4, (1,), jnp.float32, -bound2, bound2)
    return w1, b1, w2, b2


if __name__ == "__main__":
    key = jax.random.PRNGKey(0)
    kx, kp, kx2 = jax.random.split(key, 3)

    batch, input_size = 8, 32
    x = jax.random.normal(kx, (batch, input_size), dtype=jnp.float32)
    w1, b1, w2, b2 = init_params(kp, input_size)

    out = jax.block_until_ready(mlp_forward(x, w1, b1, w2, b2))
    ref = jnp.tanh(jnp.tanh(x @ w1 + b1) @ w2 + b2)
    assert out.shape == (batch, 1)
    assert bool(jnp.all(jnp.isfinite(out)))
    # bf16 MXU / bf16 tanh internally -> compare at bf16-level tolerance.
    assert jnp.allclose(out, ref, atol=5e-2), (
        f"mismatch vs reference: max abs diff {float(jnp.max(jnp.abs(out - ref)))}")

    # Larger batch: exercises the cdiv grid + ragged final block (3 tiles of 128).
    batch2 = 300
    x2 = jax.random.normal(kx2, (batch2, input_size), dtype=jnp.float32)
    out2 = jax.block_until_ready(mlp_forward(x2, w1, b1, w2, b2, tile_b=128))
    ref2 = jnp.tanh(jnp.tanh(x2 @ w1 + b1) @ w2 + b2)
    assert out2.shape == (batch2, 1)
    assert jnp.allclose(out2, ref2, atol=5e-2), (
        f"mismatch vs reference (tiled): max abs diff "
        f"{float(jnp.max(jnp.abs(out2 - ref2)))}")

    print("KERNEL_OK")
</pallas_src>

<mosaic_0001>
module attributes {stable_mosaic.version = 11 : i64} {
  func.func @mlp_kernel(%arg0: i32, %arg1: memref<8x32xf32, #tpu.memory_space<vmem>>, %arg2: memref<64x32xbf16, #tpu.memory_space<vmem>>, %arg3: memref<64x1xf32, #tpu.memory_space<vmem>>, %arg4: memref<1x64xbf16, #tpu.memory_space<vmem>>, %arg5: memref<1x1xf32, #tpu.memory_space<smem>>, %arg6: memref<1x8xf32, #tpu.memory_space<vmem>>) attributes {dimension_semantics = [#tpu.dimension_semantics<parallel>], iteration_bounds = array<i64: 1>, scalar_prefetch = 0 : i64, scratch_operands = 0 : i64, tpu.core_type = #tpu.core_type<tc>, window_params = [{transform_indices = @transform_0, window_bounds = array<i64: 8, 32>}, {pipeline_mode = #tpu.pipeline_mode<synchronous>, transform_indices = @transform_1, window_bounds = array<i64: 64, 32>}, {pipeline_mode = #tpu.pipeline_mode<synchronous>, transform_indices = @transform_2, window_bounds = array<i64: 64, 1>}, {pipeline_mode = #tpu.pipeline_mode<synchronous>, transform_indices = @transform_3, window_bounds = array<i64: 1, 64>}, {transform_indices = @transform_4, window_bounds = array<i64: 1, 1>}, {transform_indices = @transform_5, window_bounds = array<i64: 1, 8>}]} {
    %c0 = arith.constant 0 : index
    %c0_0 = arith.constant 0 : index
    %0 = vector.load %arg1[%c0, %c0_0] : memref<8x32xf32, #tpu.memory_space<vmem>>, vector<8x32xf32>
    %1 = arith.truncf %0 : vector<8x32xf32> to vector<8x32xbf16>
    %c0_1 = arith.constant 0 : index
    %c0_2 = arith.constant 0 : index
    %2 = vector.load %arg2[%c0_1, %c0_2] : memref<64x32xbf16, #tpu.memory_space<vmem>>, vector<64x32xbf16>
    %cst = arith.constant dense<0.000000e+00> : vector<64x8xf32>
    %3 = tpu.matmul %2, %1, %cst {dimension_numbers = #tpu.dot_dimension_numbers<[1], [1], [0], [0], [0, 0, 1, 0], [], []>} : vector<64x32xbf16>, vector<8x32xbf16>, vector<64x8xf32> -> vector<64x8xf32>
    %c0_3 = arith.constant 0 : index
    %c0_4 = arith.constant 0 : index
    %4 = vector.load %arg3[%c0_3, %c0_4] : memref<64x1xf32, #tpu.memory_space<vmem>>, vector<64x1xf32>
    %5 = vector.broadcast %4 : vector<64x1xf32> to vector<64x8xf32>
    %6 = arith.addf %3, %5 : vector<64x8xf32>
    %7 = arith.truncf %6 : vector<64x8xf32> to vector<64x8xbf16>
    %8 = math.tanh %7 : vector<64x8xbf16>
    %c0_5 = arith.constant 0 : index
    %c0_6 = arith.constant 0 : index
    %9 = vector.load %arg4[%c0_5, %c0_6] : memref<1x64xbf16, #tpu.memory_space<vmem>>, vector<1x64xbf16>
    %cst_7 = arith.constant dense<0.000000e+00> : vector<1x8xf32>
    %10 = tpu.matmul %9, %8, %cst_7 {dimension_numbers = #tpu.dot_dimension_numbers<[1], [0], [0], [1], [0, 0, 1, 1], [], []>} : vector<1x64xbf16>, vector<64x8xbf16>, vector<1x8xf32> -> vector<1x8xf32>
    %c0_8 = arith.constant 0 : index
    %c0_9 = arith.constant 0 : index
    %11 = memref.load %arg5[%c0_8, %c0_9] : memref<1x1xf32, #tpu.memory_space<smem>>
    %12 = vector.broadcast %11 : f32 to vector<1x8xf32>
    %13 = arith.addf %10, %12 : vector<1x8xf32>
    %14 = math.tanh %13 : vector<1x8xf32>
    %c0_10 = arith.constant 0 : index
    %c0_11 = arith.constant 0 : index
    %15 = vector.load %arg6[%c0_10, %c0_11] : memref<1x8xf32, #tpu.memory_space<vmem>>, vector<1x8xf32>
    tpu.vector_store %arg6[%c0_10, %c0_11], %14 {strides = array<i32>} : memref<1x8xf32, #tpu.memory_space<vmem>>, vector<1x8xf32>,
    return
  }
  func.func @transform_0(%arg0: i32) -> (i32, i32) {
    %c0_i32 = arith.constant 0 : i32
    %c0_i32_0 = arith.constant 0 : i32
    return %arg0, %c0_i32 : i32, i32
  }
  func.func @transform_1(%arg0: i32) -> (i32, i32) {
    %c0_i32 = arith.constant 0 : i32
    %c0_i32_0 = arith.constant 0 : i32
    %c0_i32_1 = arith.constant 0 : i32
    return %c0_i32, %c0_i32_0 : i32, i32
  }
  func.func @transform_2(%arg0: i32) -> (i32, i32) {
    %c0_i32 = arith.constant 0 : i32
    %c0_i32_0 = arith.constant 0 : i32
    %c0_i32_1 = arith.constant 0 : i32
    return %c0_i32, %c0_i32_0 : i32, i32
  }
  func.func @transform_3(%arg0: i32) -> (i32, i32) {
    %c0_i32 = arith.constant 0 : i32
    %c0_i32_0 = arith.constant 0 : i32
    %c0_i32_1 = arith.constant 0 : i32
    return %c0_i32, %c0_i32_0 : i32, i32
  }
  func.func @transform_4(%arg0: i32) -> (i32, i32) {
    %c0_i32 = arith.constant 0 : i32
    %c0_i32_0 = arith.constant 0 : i32
    %c0_i32_1 = arith.constant 0 : i32
    return %c0_i32, %c0_i32_0 : i32, i32
  }
  func.func @transform_5(%arg0: i32) -> (i32, i32) {
    %c0_i32 = arith.constant 0 : i32
    %c0_i32_0 = arith.constant 0 : i32
    return %c0_i32, %arg0 : i32, i32
  }
}

</mosaic_0001>

<bundles_post_ra>
// kernel: tpu_custom_call.1
= control target key start
LH: loop header
LB: loop body
LE: loop exit
PB: predicated region body
PF: predicated region fallthrough
CT: control target
= control target key end

     0   :  { %vm101_vm0 = vcmask 261120   ;;  %v285_v2 = vmov 0   ;;  %s370_s0 = inlined_call_operand.vmem [shape: f32[8,32], index: 0, kind: input, shape index: {}]   ;;  %s371_s1 = inlined_call_operand.vmem [shape: bf16[64,32], index: 1, kind: input, shape index: {}]   ;;  %s372_s2 = inlined_call_operand.vmem [shape: f32[64,1], index: 2, kind: input, shape index: {}]   ;;  %s373_s3 = inlined_call_operand.vmem [shape: bf16[1,64], index: 3, kind: input, shape index: {}]   ;;  %s374_s4 = inlined_call_operand.<no memory space> [shape: f32[1,1], index: 4, kind: input, shape index: {}]   ;;  %s375_s5 = inlined_call_operand.hbm [shape: f32[1,8], index: 5, kind: output, shape index: {}]  }
   0x1   :  { %v23_v0 = vld [vmem:[%s370_s0] sm:$0xff]  ;;  %239 = vset.pattern.permute.xlu1 %v285_v2  ;;  %238 = vset.pattern.permute.xlu0 %v285_v2  ;;  %v39_v3 = vld [vmem:[%s372_s2 + $0x30] sm:$0xff] }
   0x2   :  { %v24_v1 = vpack.c.bf16 %v23_v0, %v23_v0  ;;  %v37_v4 = vld [vmem:[%s372_s2 + $0x20] sm:$0xff]  ;;  %73 = vperm.xlu0 %238, %v39_v3   ;;  %240 = vset.pattern.permute.xlu2 %v285_v2  ;;  %v35_v6 = vld [vmem:[%s372_s2 + $0x10] sm:$0xff] }
   0x3   :  { %63 = vperm.xlu1 %239, %v37_v4  }
   0x4   :  { %v115_v5 = vsel %vm101_vm0, %v24_v1, 0 }
   0x5   :  { %234 = vmatpush.bf16.xpose.msra.mxu2 %v115_v5  ;;  %235 = vmatpush.bf16.xpose.msra.mxu3 %v115_v5 }
   0x6   :  { %11 = vsyncpa [#allocation4], 0  ;;  %124 = vmatpush.bf16.xpose.msra.mxu0 %v115_v5  ;;  %53 = vperm.xlu2 %240, %v35_v6   ;;  %v231_v7 = vld [vmem:[%s371_s1 + $0x8] sm:$0xff]  ;;  %v233_v8 = vld [vmem:[%s371_s1 + $0x18] sm:$0xff]  ;;  %vm173_vm1 = vcmask 523264   ;;  %v172_v1 = vstv %s374_s4  ;;  %s286_s20 = smov [#allocation3]  }
   0x7   :  { %v40_v9 = vld [vmem:[%s372_s2 + $0x38] sm:$0xff]  ;;  %v38_v10 = vld [vmem:[%s372_s2 + $0x28] sm:$0xff]  ;;  %v230_v11 = vld [vmem:[%s371_s1] sm:$0xff]  ;;  %s198_s21 = sshll.u32 %s286_s20, 4  ;;  %s200_s24 = sshll.u32 %s375_s5, 4  ;;  %vm191_vm2 = vcmask 57344   ;;  %s199_s21 = int_to_ptr.vmem [resolvable:$true] %s198_s21  ;;  %s201_s24 = int_to_ptr.hbm [resolvable:$true] %s200_s24 }
   0x8   :  { %v36_v12 = vld [vmem:[%s372_s2 + $0x18] sm:$0xff]  ;;  %v34_v13 = vld [vmem:[%s372_s2 + $0x8] sm:$0xff]  ;;  %v33_v14 = vld [vmem:[%s372_s2] sm:$0xff] }
   0x9   :  { %v232_v15 = vld [vmem:[%s371_s1 + $0x10] sm:$0xff]  ;;  %v170_v0 = vld [vmem:[%s373_s3] sm:$0x1] }
   0xa   :  { %78 = vperm.xlu0 %238, %v40_v9  }
   0xb   :  { %68 = vperm.xlu1 %239, %v38_v10  }
   0xc   :  { %226 = vmatmul.msk.bf16.vlgmr.msra.gmra.mxu2 %vm101_vm0, %v231_v7  ;;  %228 = vmatmul.msk.bf16.vlgmr.msra.gmra.mxu3 %vm101_vm0, %v233_v8 }
   0xd   :  { %225 = vmatmul.msk.bf16.vlgmr.msra.gmra.mxu0 %vm101_vm0, %v230_v11 }
   0xe   :  { %58 = vperm.xlu2 %240, %v36_v12  }
  0x12   :  { %43 = vperm.xlu0 %238, %v33_v14  }
  0x13   :  { %48 = vperm.xlu1 %239, %v34_v13  }
  0x1c   :  { %227 = vmatmul.msk.bf16.gmra.mxu2 %vm101_vm0, %v232_v15 }
  0x60   :  { %v54_v20 = vpop.permute.xlu2 %53 }
  0x68   :  { %v59_v32 = vpop.permute.xlu2 %58 }
  0x74   :  { %v74_v16 = vpop.permute.xlu0 %73 }
  0x75   :  { %v64_v17 = vpop.permute.xlu1 %63 }
  0x7c   :  { %v79_v21 = vpop.permute.xlu0 %78 }
  0x7d   :  { %v69_v26 = vpop.permute.xlu1 %68 }
  0x84   :  { %v44_v35 = vpop.permute.xlu0 %43 }
  0x85   :  { %v49_v33 = vpop.permute.xlu1 %48 }
  0x8a   :  { %v126_v27 = vpop.f32.mrf.mxu0 }
  0x8b   :  { %v127_v40 = vadd.f32 %v126_v27, %v44_v35 }
  0x8f   :  { %v131_v18 = vpop.f32.mrf.mxu2  ;;  %v141_v19 = vpop.f32.mrf.mxu3 }
  0x90   :  { %v142_v22 = vadd.f32 %v141_v19, %v74_v16  ;;  %v132_v38 = vadd.f32 %v131_v18, %v54_v20 }
  0x92   :  { %v128_v36 = vpop.f32.mrf.mxu0 }
  0x93   :  { %v129_v41 = vadd.f32 %v128_v36, %v49_v33 }
  0x95   :  { %v146_v49 = vpack.c.bf16 %v129_v41, %v127_v40 }
  0x97   :  { %v133_v23 = vpop.f32.mrf.mxu2  ;;  %v143_v24 = vpop.f32.mrf.mxu3  ;;  %v150_v53 = vunpack.c.l.bf16 %v146_v49  ;;  %v151_v54 = vunpack.c.h.bf16 %v146_v49 }
  0x98   :  { %v144_v25 = vadd.f32 %v143_v24, %v79_v21  ;;  %v134_v34 = vadd.f32 %v133_v23, %v59_v32 }
  0x9a   :  { %v149_v28 = vpack.c.bf16 %v144_v25, %v142_v22  ;;  %v147_v43 = vpack.c.bf16 %v134_v34, %v132_v38 }
  0x9c   :  { %v156_v29 = vunpack.c.l.bf16 %v149_v28  ;;  %v157_v30 = vunpack.c.h.bf16 %v149_v28  ;;  %v152_v48 = vunpack.c.l.bf16 %v147_v43  ;;  %v153_v52 = vunpack.c.h.bf16 %v147_v43 }
  0x9e   :  { %241 = vtanh.f32 %v156_v29 }
  0x9f   :  { %v136_v31 = vpop.f32.mrf.mxu2  ;;  %243 = vtanh.f32 %v157_v30 }
  0xa0   :  { %v137_v44 = vadd.f32 %v136_v31, %v64_v17 }
  0xa4   :  { %v242_v37 = vpop.eup %241 }
  0xa5   :  { %v244_v39 = vpop.eup %243 }
  0xa6   :  { %v169_v46 = vpack.c.bf16 %v244_v39, %v242_v37 }
  0xa7   :  { %v138_v42 = vpop.f32.mrf.mxu2 }
  0xa8   :  { %v139_v45 = vadd.f32 %v138_v42, %v69_v26  ;;  %181 = vmatpush.bf16.msra.mxu1 %v169_v46 }
  0xaa   :  { %v148_v47 = vpack.c.bf16 %v139_v45, %v137_v44 }
  0xac   :  { %v154_v50 = vunpack.c.l.bf16 %v148_v47  ;;  %v155_v51 = vunpack.c.h.bf16 %v148_v47 }
  0xae   :  { %245 = vtanh.f32 %v154_v50 }
  0xaf   :  { %247 = vtanh.f32 %v155_v51 }
  0xb0   :  { %249 = vtanh.f32 %v152_v48 }
  0xb1   :  { %251 = vtanh.f32 %v153_v52 }
  0xb2   :  { %253 = vtanh.f32 %v150_v53 }
  0xb3   :  { %255 = vtanh.f32 %v151_v54 }
  0xb4   :  { %v246_v55 = vpop.eup %245 }
  0xb5   :  { %v248_v56 = vpop.eup %247 }
  0xb6   :  { %v250_v57 = vpop.eup %249  ;;  %v168_v58 = vpack.c.bf16 %v248_v56, %v246_v55 }
  0xb7   :  { %v252_v59 = vpop.eup %251 }
  0xb8   :  { %182 = vmatpush.bf16.msra.mxu1 %v168_v58  ;;  %v254_v60 = vpop.eup %253  ;;  %v167_v61 = vpack.c.bf16 %v252_v59, %v250_v57 }
  0xb9   :  { %v256_v62 = vpop.eup %255 }
  0xba   :  { %v166_v63 = vpack.c.bf16 %v256_v62, %v254_v60 }
  0xbc   :  { %183 = vmatpush.bf16.msra.mxu1 %v167_v61 }
  0xc0   :  { %184 = vmatpush.bf16.msra.mxu1 %v166_v63 }
  0xc3   :  { %229 = vmatmul.msk.bf16.vlgmr.msra.gmra.mxu1 %vm173_vm1, %v170_v0 }
 0x140   :  { %v186_v2 = vpop.f32.mrf.mxu1 }
 0x141   :  { %v187_v3 = vadd.f32 %v186_v2, %v172_v1 }
 0x143   :  { %257 = vtanh.f32 %v187_v3 }
 0x148   :  { %v188_v4 = vpop.f32.mrf.mxu1 }
 0x149   :  { %v258_v5 = vpop.eup %257 }
 0x14a   :  { %192 = vst.msk [vmem:[#allocation3] sm:$0x1] %vm191_vm2, %v258_v5 }
 0x14b   :  { %203 = dma.vmem_to_hbm [thread:$0]  %s199_s21, 16, %s201_s24, [#allocation4]  }
 0x14c   :  { %283 = dma.done.wait [#allocation4], 16  }
 0x14d   :  { %284 = vsyncadd [#allocation4], 4294967280 }
 0x14e   :  { %208 = vsyncpa [#allocation4], 1 }

</bundles_post_ra>
